<compile_context>
chip_gen: v7x
topology: tpu7x:2x2x1
jax: 0.10.0
libtpu: 0.0.40
codegen_flags: <defaults>
</compile_context>

<pallas_src>
import math
import jax
import jax.numpy as jnp
from jax.experimental import pallas as pl
from jax.experimental.pallas import tpu as pltpu


# ----------------------------- Pallas kernel --------------------------------
def _diffusion_embedding_kernel(step_ref, table_ref, w1_ref, b1_ref, w2_ref,
                                b2_ref, o_ref, x_scratch):
    # step_ref : SMEM [B] int32     (scalar-prefetched diffusion steps)
    # table_ref: VMEM [T, E] f32    (sinusoidal embedding table)
    # w1_ref   : VMEM [E, P] bf16   b1_ref: VMEM [1, P] f32
    # w2_ref   : VMEM [P, P] bf16   b2_ref: VMEM [1, P] f32
    # o_ref    : VMEM [B, P] f32
    # x_scratch: VMEM [B, E] f32
    B = x_scratch.shape[0]

    # Fused gather: x = embedding[diffusion_step]   (unrolled; grid stays ()).
    for i in range(B):
        idx = step_ref[i]
        x_scratch[pl.ds(i, 1), :] = table_ref[pl.ds(idx, 1), :]

    # bf16 MXU operands, f32 accumulation; elementwise stays f32 (v5e-safe).
    x = x_scratch[...].astype(jnp.bfloat16)
    h = jnp.dot(x, w1_ref[...], preferred_element_type=jnp.float32) + b1_ref[...]
    h = h * pl.reciprocal(1.0 + jnp.exp(-h), approx=True)            # SiLU

    h2 = jnp.dot(h.astype(jnp.bfloat16), w2_ref[...],
                 preferred_element_type=jnp.float32) + b2_ref[...]
    o_ref[...] = (h2 * pl.reciprocal(1.0 + jnp.exp(-h2), approx=True)
                  ).astype(o_ref.dtype)


def diffusion_embedding_forward(diffusion_step, table, w1, b1, w2, b2):
    """diffusion_step: [B] int; table: [T,E] f32; w*: [in,out] bf16; b*: [1,out] f32."""
    B = diffusion_step.shape[0]
    E = table.shape[1]
    P = w1.shape[1]

    def vmem():
        # Full-array, whole thing DMA'd to VMEM (grid=() -> no blocking needed).
        return pl.BlockSpec(memory_space=pltpu.MemorySpace.VMEM)

    return pl.pallas_call(
        _diffusion_embedding_kernel,
        out_shape=jax.ShapeDtypeStruct((B, P), jnp.float32),
        grid_spec=pltpu.PrefetchScalarGridSpec(
            num_scalar_prefetch=1,          # diffusion_step -> SMEM
            grid=(),
            in_specs=[vmem(), vmem(), vmem(), vmem(), vmem()],
            out_specs=vmem(),
            scratch_shapes=[pltpu.VMEM((B, E), jnp.float32)],
        ),
    )(diffusion_step.astype(jnp.int32), table, w1, b1, w2, b2)


# ------------------------- Parameter / buffer setup -------------------------
def build_embedding(num_steps, half_dim):
    # Mirrors DiffusionEmbedding._build_embedding (half_dim = embedding_dim / 2).
    steps = jnp.arange(num_steps, dtype=jnp.float32)[:, None]                  # [T, 1]
    freqs = 10.0 ** (jnp.arange(half_dim, dtype=jnp.float32)
                     / (half_dim - 1.0) * 4.0)[None, :]                        # [1, D]
    table = steps * freqs                                                      # [T, D]
    return jnp.concatenate([jnp.sin(table), jnp.cos(table)], axis=1)           # [T, 2D]


def init_linear(key, in_features, out_features):
    # Deterministic init matching nn.Linear's uniform(-1/sqrt(in), 1/sqrt(in)).
    kw, kb = jax.random.split(key)
    bound = 1.0 / math.sqrt(in_features)
    # Weights pre-transposed [in, out] and stored bf16 for the MXU;
    # biases stay f32 (added post-accumulation).
    w = jax.random.uniform(kw, (in_features, out_features), jnp.float32,
                           minval=-bound, maxval=bound).astype(jnp.bfloat16)
    b = jax.random.uniform(kb, (1, out_features), jnp.float32,
                           minval=-bound, maxval=bound)
    return w, b


# ----------------------------------- Main ------------------------------------
if __name__ == "__main__":
    num_steps = 50
    embedding_dim = 128
    projection_dim = 128
    batch = 8

    key = jax.random.PRNGKey(0)
    k1, k2, k3 = jax.random.split(key, 3)

    embedding = build_embedding(num_steps, embedding_dim // 2)   # [50, 128] f32
    w1, b1 = init_linear(k1, embedding_dim, projection_dim)
    w2, b2 = init_linear(k2, projection_dim, projection_dim)

    # Integer diffusion steps (forward input of the module).
    diffusion_step = jax.random.randint(k3, (batch,), 0, num_steps)

    # Single fused kernel call: gather + proj1 + SiLU + proj2 + SiLU.
    out = diffusion_embedding_forward(diffusion_step, embedding, w1, b1, w2, b2)
    out = jax.block_until_ready(out)

    # Reference in plain JAX (same bf16 MXU operands, exact sigmoid).
    def ref(steps):
        x = embedding[steps].astype(jnp.bfloat16)
        h = jnp.dot(x, w1, preferred_element_type=jnp.float32) + b1
        h = h * jax.nn.sigmoid(h)
        h2 = jnp.dot(h.astype(jnp.bfloat16), w2,
                     preferred_element_type=jnp.float32) + b2
        return h2 * jax.nn.sigmoid(h2)

    ref_out = ref(diffusion_step)
    assert out.shape == (batch, projection_dim)
    max_err = float(jnp.max(jnp.abs(out - ref_out)))
    assert jnp.allclose(out, ref_out, atol=2e-2, rtol=2e-2), f"max_err={max_err}"

    # Amortization path: precompute the whole [num_steps, P] output table once
    # (one launch, one weight DMA), then a per-step lookup replaces per-step calls.
    all_steps = jnp.arange(num_steps, dtype=jnp.int32)
    full_out = jax.block_until_ready(
        diffusion_embedding_forward(all_steps, embedding, w1, b1, w2, b2))
    assert full_out.shape == (num_steps, projection_dim)
    assert jnp.allclose(full_out[diffusion_step], out, atol=1e-4, rtol=1e-4)

    print("KERNEL_OK")
</pallas_src>

<mosaic_0001>
module attributes {stable_mosaic.version = 11 : i64} {
  func.func @_diffusion_embedding_kernel(%arg0: memref<8xi32, #tpu.memory_space<smem>>, %arg1: memref<50x128xf32, #tpu.memory_space<vmem>>, %arg2: memref<128x128xbf16, #tpu.memory_space<vmem>>, %arg3: memref<1x128xf32, #tpu.memory_space<vmem>>, %arg4: memref<128x128xbf16, #tpu.memory_space<vmem>>, %arg5: memref<1x128xf32, #tpu.memory_space<vmem>>, %arg6: memref<8x128xf32, #tpu.memory_space<vmem>>, %arg7: memref<8x128xf32, #tpu.memory_space<vmem>>) attributes {dimension_semantics = [], scalar_prefetch = 1 : i64, scratch_operands = 1 : i64, tpu.core_type = #tpu.core_type<tc>} {
    %c0 = arith.constant 0 : index
    %0 = memref.load %arg0[%c0] : memref<8xi32, #tpu.memory_space<smem>>
    %1 = arith.index_cast %0 : i32 to index
    %c0_0 = arith.constant 0 : index
    %2 = vector.load %arg1[%1, %c0_0] : memref<50x128xf32, #tpu.memory_space<vmem>>, vector<1x128xf32>
    %c0_1 = arith.constant 0 : index
    %c0_2 = arith.constant 0 : index
    %3 = vector.load %arg7[%c0_1, %c0_2] : memref<8x128xf32, #tpu.memory_space<vmem>>, vector<1x128xf32>
    tpu.vector_store %arg7[%c0_1, %c0_2], %2 {strides = array<i32>} : memref<8x128xf32, #tpu.memory_space<vmem>>, vector<1x128xf32>,
    %c1 = arith.constant 1 : index
    %4 = memref.load %arg0[%c1] : memref<8xi32, #tpu.memory_space<smem>>
    %5 = arith.index_cast %4 : i32 to index
    %c0_3 = arith.constant 0 : index
    %6 = vector.load %arg1[%5, %c0_3] : memref<50x128xf32, #tpu.memory_space<vmem>>, vector<1x128xf32>
    %c1_4 = arith.constant 1 : index
    %c0_5 = arith.constant 0 : index
    %7 = vector.load %arg7[%c1_4, %c0_5] : memref<8x128xf32, #tpu.memory_space<vmem>>, vector<1x128xf32>
    tpu.vector_store %arg7[%c1_4, %c0_5], %6 {strides = array<i32>} : memref<8x128xf32, #tpu.memory_space<vmem>>, vector<1x128xf32>,
    %c2 = arith.constant 2 : index
    %8 = memref.load %arg0[%c2] : memref<8xi32, #tpu.memory_space<smem>>
    %9 = arith.index_cast %8 : i32 to index
    %c0_6 = arith.constant 0 : index
    %10 = vector.load %arg1[%9, %c0_6] : memref<50x128xf32, #tpu.memory_space<vmem>>, vector<1x128xf32>
    %c2_7 = arith.constant 2 : index
    %c0_8 = arith.constant 0 : index
    %11 = vector.load %arg7[%c2_7, %c0_8] : memref<8x128xf32, #tpu.memory_space<vmem>>, vector<1x128xf32>
    tpu.vector_store %arg7[%c2_7, %c0_8], %10 {strides = array<i32>} : memref<8x128xf32, #tpu.memory_space<vmem>>, vector<1x128xf32>,
    %c3 = arith.constant 3 : index
    %12 = memref.load %arg0[%c3] : memref<8xi32, #tpu.memory_space<smem>>
    %13 = arith.index_cast %12 : i32 to index
    %c0_9 = arith.constant 0 : index
    %14 = vector.load %arg1[%13, %c0_9] : memref<50x128xf32, #tpu.memory_space<vmem>>, vector<1x128xf32>
    %c3_10 = arith.constant 3 : index
    %c0_11 = arith.constant 0 : index
    %15 = vector.load %arg7[%c3_10, %c0_11] : memref<8x128xf32, #tpu.memory_space<vmem>>, vector<1x128xf32>
    tpu.vector_store %arg7[%c3_10, %c0_11], %14 {strides = array<i32>} : memref<8x128xf32, #tpu.memory_space<vmem>>, vector<1x128xf32>,
    %c4 = arith.constant 4 : index
    %16 = memref.load %arg0[%c4] : memref<8xi32, #tpu.memory_space<smem>>
    %17 = arith.index_cast %16 : i32 to index
    %c0_12 = arith.constant 0 : index
    %18 = vector.load %arg1[%17, %c0_12] : memref<50x128xf32, #tpu.memory_space<vmem>>, vector<1x128xf32>
    %c4_13 = arith.constant 4 : index
    %c0_14 = arith.constant 0 : index
    %19 = vector.load %arg7[%c4_13, %c0_14] : memref<8x128xf32, #tpu.memory_space<vmem>>, vector<1x128xf32>
    tpu.vector_store %arg7[%c4_13, %c0_14], %18 {strides = array<i32>} : memref<8x128xf32, #tpu.memory_space<vmem>>, vector<1x128xf32>,
    %c5 = arith.constant 5 : index
    %20 = memref.load %arg0[%c5] : memref<8xi32, #tpu.memory_space<smem>>
    %21 = arith.index_cast %20 : i32 to index
    %c0_15 = arith.constant 0 : index
    %22 = vector.load %arg1[%21, %c0_15] : memref<50x128xf32, #tpu.memory_space<vmem>>, vector<1x128xf32>
    %c5_16 = arith.constant 5 : index
    %c0_17 = arith.constant 0 : index
    %23 = vector.load %arg7[%c5_16, %c0_17] : memref<8x128xf32, #tpu.memory_space<vmem>>, vector<1x128xf32>
    tpu.vector_store %arg7[%c5_16, %c0_17], %22 {strides = array<i32>} : memref<8x128xf32, #tpu.memory_space<vmem>>, vector<1x128xf32>,
    %c6 = arith.constant 6 : index
    %24 = memref.load %arg0[%c6] : memref<8xi32, #tpu.memory_space<smem>>
    %25 = arith.index_cast %24 : i32 to index
    %c0_18 = arith.constant 0 : index
    %26 = vector.load %arg1[%25, %c0_18] : memref<50x128xf32, #tpu.memory_space<vmem>>, vector<1x128xf32>
    %c6_19 = arith.constant 6 : index
    %c0_20 = arith.constant 0 : index
    %27 = vector.load %arg7[%c6_19, %c0_20] : memref<8x128xf32, #tpu.memory_space<vmem>>, vector<1x128xf32>
    tpu.vector_store %arg7[%c6_19, %c0_20], %26 {strides = array<i32>} : memref<8x128xf32, #tpu.memory_space<vmem>>, vector<1x128xf32>,
    %c7 = arith.constant 7 : index
    %28 = memref.load %arg0[%c7] : memref<8xi32, #tpu.memory_space<smem>>
    %29 = arith.index_cast %28 : i32 to index
    %c0_21 = arith.constant 0 : index
    %30 = vector.load %arg1[%29, %c0_21] : memref<50x128xf32, #tpu.memory_space<vmem>>, vector<1x128xf32>
    %c7_22 = arith.constant 7 : index
    %c0_23 = arith.constant 0 : index
    %31 = vector.load %arg7[%c7_22, %c0_23] : memref<8x128xf32, #tpu.memory_space<vmem>>, vector<1x128xf32>
    tpu.vector_store %arg7[%c7_22, %c0_23], %30 {strides = array<i32>} : memref<8x128xf32, #tpu.memory_space<vmem>>, vector<1x128xf32>,
    %c0_24 = arith.constant 0 : index
    %c0_25 = arith.constant 0 : index
    %32 = vector.load %arg7[%c0_24, %c0_25] : memref<8x128xf32, #tpu.memory_space<vmem>>, vector<8x128xf32>
    %33 = arith.truncf %32 : vector<8x128xf32> to vector<8x128xbf16>
    %c0_26 = arith.constant 0 : index
    %c0_27 = arith.constant 0 : index
    %34 = vector.load %arg2[%c0_26, %c0_27] : memref<128x128xbf16, #tpu.memory_space<vmem>>, vector<128x128xbf16>
    %cst = arith.constant dense<0.000000e+00> : vector<8x128xf32>
    %35 = tpu.matmul %33, %34, %cst {dimension_numbers = #tpu.dot_dimension_numbers<[1], [0], [0], [1], [0, 0, 1, 1], [], []>} : vector<8x128xbf16>, vector<128x128xbf16>, vector<8x128xf32> -> vector<8x128xf32>
    %c0_28 = arith.constant 0 : index
    %c0_29 = arith.constant 0 : index
    %36 = vector.load %arg3[%c0_28, %c0_29] : memref<1x128xf32, #tpu.memory_space<vmem>>, vector<1x128xf32>
    %37 = vector.broadcast %36 : vector<1x128xf32> to vector<8x128xf32>
    %38 = arith.addf %35, %37 : vector<8x128xf32>
    %cst_30 = arith.constant 0.000000e+00 : f32
    %39 = vector.broadcast %cst_30 : f32 to vector<8x128xf32>
    %40 = arith.subf %39, %38 : vector<8x128xf32>
    %41 = math.exp %40 : vector<8x128xf32>
    %cst_31 = arith.constant 1.000000e+00 : f32
    %42 = vector.broadcast %cst_31 : f32 to vector<8x128xf32>
    %43 = arith.addf %42, %41 : vector<8x128xf32>
    %44 = tpu.reciprocal %43 {approx = true} : vector<8x128xf32> -> vector<8x128xf32>
    %45 = arith.mulf %38, %44 : vector<8x128xf32>
    %46 = arith.truncf %45 : vector<8x128xf32> to vector<8x128xbf16>
    %c0_32 = arith.constant 0 : index
    %c0_33 = arith.constant 0 : index
    %47 = vector.load %arg4[%c0_32, %c0_33] : memref<128x128xbf16, #tpu.memory_space<vmem>>, vector<128x128xbf16>
    %cst_34 = arith.constant dense<0.000000e+00> : vector<8x128xf32>
    %48 = tpu.matmul %46, %47, %cst_34 {dimension_numbers = #tpu.dot_dimension_numbers<[1], [0], [0], [1], [0, 0, 1, 1], [], []>} : vector<8x128xbf16>, vector<128x128xbf16>, vector<8x128xf32> -> vector<8x128xf32>
    %c0_35 = arith.constant 0 : index
    %c0_36 = arith.constant 0 : index
    %49 = vector.load %arg5[%c0_35, %c0_36] : memref<1x128xf32, #tpu.memory_space<vmem>>, vector<1x128xf32>
    %50 = vector.broadcast %49 : vector<1x128xf32> to vector<8x128xf32>
    %51 = arith.addf %48, %50 : vector<8x128xf32>
    %cst_37 = arith.constant 0.000000e+00 : f32
    %52 = vector.broadcast %cst_37 : f32 to vector<8x128xf32>
    %53 = arith.subf %52, %51 : vector<8x128xf32>
    %54 = math.exp %53 : vector<8x128xf32>
    %cst_38 = arith.constant 1.000000e+00 : f32
    %55 = vector.broadcast %cst_38 : f32 to vector<8x128xf32>
    %56 = arith.addf %55, %54 : vector<8x128xf32>
    %57 = tpu.reciprocal %56 {approx = true} : vector<8x128xf32> -> vector<8x128xf32>
    %58 = arith.mulf %51, %57 : vector<8x128xf32>
    %c0_39 = arith.constant 0 : index
    %c0_40 = arith.constant 0 : index
    %59 = vector.load %arg6[%c0_39, %c0_40] : memref<8x128xf32, #tpu.memory_space<vmem>>, vector<8x128xf32>
    tpu.vector_store %arg6[%c0_39, %c0_40], %58 {strides = array<i32>} : memref<8x128xf32, #tpu.memory_space<vmem>>, vector<8x128xf32>,
    return
  }
}

</mosaic_0001>

<bundles_post_ra>
// kernel: tpu_custom_call.1
= control target key start
LH: loop header
LB: loop body
LE: loop exit
PB: predicated region body
PF: predicated region fallthrough
CT: control target
= control target key end

     0   :  { %s728_s0 = inlined_call_operand.hbm [shape: s32[8], index: 0, kind: input, shape index: {}]   ;;  %s729_s1 = inlined_call_operand.hbm [shape: f32[50,128], index: 1, kind: input, shape index: {}]   ;;  %s730_s2 = inlined_call_operand.hbm [shape: bf16[128,128], index: 2, kind: input, shape index: {}]   ;;  %s731_s3 = inlined_call_operand.vmem [shape: f32[1,128], index: 3, kind: input, shape index: {}]   ;;  %s732_s4 = inlined_call_operand.hbm [shape: bf16[128,128], index: 4, kind: input, shape index: {}]   ;;  %s733_s5 = inlined_call_operand.vmem [shape: f32[1,128], index: 5, kind: input, shape index: {}]   ;;  %s734_s6 = inlined_call_operand.hbm [shape: f32[8,128], index: 6, kind: output, shape index: {}]  }
   0x1   :  { %s480_s23 = scalar_lea.hbm %s728_s0, 16 }
   0x2   :  { %p481_p0 = scmp.ne.s32.totalorder %s728_s0, %s480_s23  ;;  %p484_p1 = scmp.lt.u32.totalorder %s480_s23, %s728_s0 }
   0x4   :  { %p486_p2 = pnand %p484_p1, %p481_p0 }
   0x6   :  { %489 = shalt.err (!%p486_p2)  }
   0x7   :  { %s586_s28 = smov [#allocation4]  }
   0x8   :  { %12 = dma.hbm_to_smem %s728_s0, 16, %s586_s28, [#allocation3] }
   0x9   :  { %578 = dma.done.wait [#allocation3], 16 }
   0xa   :  { %579 = vsyncadd [#allocation3], 4294967280 }
   0xb   :  { %14 = sfence }
   0xc   :  { %15 = vsyncpa [#allocation6], 0 }
   0xd   :  { %16 = vsyncpa [#allocation9], 0 }
   0xe   :  { %17 = vsyncpa [#allocation7], 0  ;;  %s587_s7 = smov [#allocation8]   ;;  %s490_s11 = scalar_lea.hbm %s730_s2, 1024 }
   0xf   :  { %s35_s8 = sshll.u32 %s587_s7, 4  ;;  %p491_p3 = scmp.ne.s32.totalorder %s730_s2, %s490_s11  ;;  %s36_s8 = int_to_ptr.vmem [resolvable:$true] %s35_s8 }
  0x10   :  { %p494_p4 = scmp.lt.u32.totalorder %s490_s11, %s730_s2 }
  0x12   :  { %p496_p5 = pnand %p494_p4, %p491_p3 }
  0x14   :  { %499 = shalt.err (!%p496_p5)
}
  0x15   :  { %s500_s0 = scalar_lea.vmem %s36_s8, 1024  ;;  %p505_p7 = scmp.lt.s32.totalorder %s36_s8, %s36_s8 }
  0x16   :  { %p501_p6 = scmp.ne.s32.totalorder %s36_s8, %s500_s0  ;;  %p506_p8 = scmp.lt.s32.totalorder %s500_s0, %s500_s0 }
  0x18   :  { %p507_p9 = por %p506_p8, %p505_p7 }
  0x1a   :  { %p508_p10 = pnand %p507_p9, %p501_p6 }
  0x1c   :  { %511 = shalt.err (!%p508_p10)
}
  0x1d   :  { %s588_s16 = smov 64   ;;  %s589_s17 = smov 4  }
  0x1e   :  { %41 = dma.hbm_to_vmem [thread:$0]  %s730_s2, 1024, %s36_s8, [#allocation9], %s588_s16, %s588_s16, %s589_s17  }
  0x1f   :  { %s590_s20 = smov [#allocation5]   ;;  %s512_s24 = scalar_lea.hbm %s729_s1, 896 }
  0x20   :  { %s23_s21 = sshll.u32 %s590_s20, 4  ;;  %p513_p11 = scmp.ne.s32.totalorder %s729_s1, %s512_s24  ;;  %s24_s21 = int_to_ptr.vmem [resolvable:$true] %s23_s21 }
  0x21   :  { %p516_p12 = scmp.lt.u32.totalorder %s512_s24, %s729_s1 }
  0x23   :  { %p518_p13 = pnand %p516_p12, %p513_p11 }
  0x25   :  { %521 = shalt.err (!%p518_p13)
}
  0x26   :  { %s522_s29 = scalar_lea.vmem %s24_s21, 896  ;;  %p527_p1 = scmp.lt.s32.totalorder %s24_s21, %s24_s21 }
  0x27   :  { %p523_p0 = scmp.ne.s32.totalorder %s24_s21, %s522_s29  ;;  %p528_p2 = scmp.lt.s32.totalorder %s522_s29, %s522_s29 }
  0x29   :  { %p529_p3 = por %p528_p2, %p527_p1 }
  0x2b   :  { %p530_p4 = pnand %p529_p3, %p523_p0 }
  0x2d   :  { %533 = shalt.err (!%p530_p4)
}
  0x2e   :  { %s591_s2 = smov 128   ;;  %s592_s30 = smov 8  }
  0x2f   :  { %29 = dma.hbm_to_vmem [thread:$0]  %s729_s1, 896, %s24_s21, [#allocation6], %s591_s2, %s591_s2, %s592_s30  }
  0x30   :  { %s593_s9 = smov [#allocation10]   ;;  %s534_s13 = scalar_lea.hbm %s732_s4, 1024 }
  0x31   :  { %s49_s10 = sshll.u32 %s593_s9, 4  ;;  %p535_p5 = scmp.ne.s32.totalorder %s732_s4, %s534_s13  ;;  %s50_s10 = int_to_ptr.vmem [resolvable:$true] %s49_s10 }
  0x32   :  { %p538_p6 = scmp.lt.u32.totalorder %s534_s13, %s732_s4 }
  0x34   :  { %p540_p7 = pnand %p538_p6, %p535_p5 }
  0x36   :  { %543 = shalt.err (!%p540_p7)
}
  0x37   :  { %s544_s19 = scalar_lea.vmem %s50_s10, 1024  ;;  %p549_p9 = scmp.lt.s32.totalorder %s50_s10, %s50_s10 }
  0x38   :  { %p545_p8 = scmp.ne.s32.totalorder %s50_s10, %s544_s19  ;;  %p550_p10 = scmp.lt.s32.totalorder %s544_s19, %s544_s19 }
  0x3a   :  { %p551_p11 = por %p550_p10, %p549_p9 }
  0x3c   :  { %p552_p12 = pnand %p551_p11, %p545_p8 }
  0x3e   :  { %555 = shalt.err (!%p552_p12)
}
  0x3f   :  { %55 = dma.hbm_to_vmem [thread:$0]  %s732_s4, 1024, %s50_s10, [#allocation9], %s588_s16, %s588_s16, %s589_s17  }
  0x40   :  { %580 = dma.done.wait [#allocation6], 896  }
  0x41   :  { %581 = vsyncadd [#allocation6], 4294966400 }
  0x42   :  { %582 = dma.done.wait [#allocation9], 2048  }
  0x43   :  { %583 = vsyncadd [#allocation9], 4294965248  ;;  %v594_v0 = vmov 0.0   ;;  %vm595_vm0 = vmmov 0   ;;  %s68_s21 = sld [smem:[#allocation4]]  ;;  %s362_s22 = sld [smem:[#allocation4 + $0x1]] }
  0x44   :  { %405 = vmatprep.subr.bf16.mxu0 %v594_v0  ;;  %421 = vmatprep.mubr.msk.bf16.mxu0 %vm595_vm0, %v594_v0  ;;  %s363_s23 = sld [smem:[#allocation4 + $0x2]]  ;;  %s364_s24 = sld [smem:[#allocation4 + $0x3]]  ;;  %v456_v1 = vld [vmem:[#allocation8] sm:$0xff]   ;;  %v457_v2 = vld [vmem:[#allocation8 + $0x8] sm:$0xff]   ;;  %v458_v3 = vld [vmem:[#allocation8 + $0x10] sm:$0xff]  }
  0x45   :  { %425 = vmatprep.subr.bf16.mxu1 %v594_v0  ;;  %441 = vmatprep.mubr.msk.bf16.mxu1 %vm595_vm0, %v594_v0  ;;  %s365_s25 = sld [smem:[#allocation4 + $0x4]]  ;;  %s366_s4 = sld [smem:[#allocation4 + $0x5]]  ;;  %v459_v10 = vld [vmem:[#allocation8 + $0x18] sm:$0xff]   ;;  %v460_v13 = vld [vmem:[#allocation8 + $0x20] sm:$0xff]   ;;  %v461_v14 = vld [vmem:[#allocation8 + $0x28] sm:$0xff]  }
  0x46   :  { %s690_s16 = sld [smem:[#allocation4 + $0x6]]  ;;  %s692_s17 = sld [smem:[#allocation4 + $0x7]]  ;;  %406 = vmatpush3.bf16.msra.mxu0 %v456_v1  ;;  %v462_v15 = vld [vmem:[#allocation8 + $0x30] sm:$0xff]   ;;  %v463_v16 = vld [vmem:[#allocation8 + $0x38] sm:$0xff]   ;;  %v464_v19 = vld [vmem:[#allocation10] sm:$0xff]  }
  0x47   :  { %407 = vmatprep.subr.bf16.mxu0 %v594_v0  ;;  %426 = vmatpush3.bf16.msra.mxu1 %v464_v19  ;;  %v465_v20 = vld [vmem:[#allocation10 + $0x8] sm:$0xff]   ;;  %v466_v21 = vld [vmem:[#allocation10 + $0x10] sm:$0xff]   ;;  %v467_v22 = vld [vmem:[#allocation10 + $0x18] sm:$0xff]  }
  0x48   :  { %427 = vmatprep.subr.bf16.mxu1 %v594_v0  ;;  %v468_v23 = vld [vmem:[#allocation10 + $0x20] sm:$0xff]   ;;  %v469_v24 = vld [vmem:[#allocation10 + $0x28] sm:$0xff]   ;;  %v470_v25 = vld [vmem:[#allocation10 + $0x30] sm:$0xff]  }
  0x49   :  { %s69_s26 = scalar_lea.vmem [#allocation5], %s68_s21  ;;  %s73_s27 = scalar_lea.vmem [#allocation5], %s362_s22  ;;  %v471_v26 = vld [vmem:[#allocation10 + $0x38] sm:$0xff]   ;;  %v369_v27 = vld [vmem:[%s731_s3] ss:$0 sm:$0xff] }
  0x4a   :  { %408 = vmatpush3.bf16.msra.mxu0 %v457_v2  ;;  %v70_v4 = vld [vmem:[%s69_s26] sm:$0x1]  ;;  %s77_s28 = scalar_lea.vmem [#allocation5], %s363_s23  ;;  %s81_s29 = scalar_lea.vmem [#allocation5], %s364_s24 }
  0x4b   :  { %409 = vmatprep.subr.bf16.mxu0 %v594_v0  ;;  %v74_v5 = vld [vmem:[%s73_s27] sm:$0x1]  ;;  %71 = vst [vmem:[#allocation2] sm:$0x1] %v70_v4  ;;  %s85_s2 = scalar_lea.vmem [#allocation5], %s365_s25  ;;  %s89_s30 = scalar_lea.vmem [#allocation5], %s366_s4  ;;  %428 = vmatpush3.bf16.msra.mxu1 %v465_v20 }
  0x4c   :  { %v78_v6 = vld [vmem:[%s77_s28] sm:$0x1]  ;;  %75 = vst [vmem:[#allocation2 + $0x1] sm:$0x1] %v74_v5  ;;  %s93_s7 = scalar_lea.vmem [#allocation5], %s690_s16  ;;  %s97_s8 = scalar_lea.vmem [#allocation5], %s692_s17  ;;  %429 = vmatprep.subr.bf16.mxu1 %v594_v0 }
  0x4d   :  { %79 = vst [vmem:[#allocation2 + $0x2] sm:$0x1] %v78_v6  ;;  %v82_v7 = vld [vmem:[%s81_s29] sm:$0x1]  ;;  %s596_s3 = smov [#allocation11]  }
  0x4e   :  { %v86_v8 = vld [vmem:[%s85_s2] sm:$0x1]  ;;  %410 = vmatpush3.bf16.msra.mxu0 %v458_v3  ;;  %83 = vst [vmem:[#allocation2 + $0x3] sm:$0x1] %v82_v7  ;;  %s344_s13 = sshll.u32 %s596_s3, 4  ;;  %s345_s13 = int_to_ptr.vmem [resolvable:$true] %s344_s13 }
  0x4f   :  { %v90_v9 = vld [vmem:[%s89_s30] sm:$0x1]  ;;  %87 = vst [vmem:[#allocation2 + $0x4] sm:$0x1] %v86_v8  ;;  %411 = vmatprep.subr.bf16.mxu0 %v594_v0  ;;  %430 = vmatpush3.bf16.msra.mxu1 %v466_v21  ;;  %s556_s14 = scalar_lea.vmem %s345_s13, 128  ;;  %p561_p0 = scmp.lt.s32.totalorder %s345_s13, %s345_s13 }
  0x50   :  { %91 = vst [vmem:[#allocation2 + $0x5] sm:$0x1] %v90_v9  ;;  %v94_v11 = vld [vmem:[%s93_s7] sm:$0x1]  ;;  %431 = vmatprep.subr.bf16.mxu1 %v594_v0  ;;  %p557_p13 = scmp.ne.s32.totalorder %s345_s13, %s556_s14  ;;  %p562_p1 = scmp.lt.s32.totalorder %s556_s14, %s556_s14 }
  0x51   :  { %v98_v12 = vld [vmem:[%s97_s8] sm:$0x1]  ;;  %95 = vst [vmem:[#allocation2 + $0x6] sm:$0x1] %v94_v11 }
  0x52   :  { %99 = vst [vmem:[#allocation2 + $0x7] sm:$0x1] %v98_v12  ;;  %412 = vmatpush3.bf16.msra.mxu0 %v459_v10  ;;  %v378_v40 = vld [vmem:[%s733_s5] ss:$0 sm:$0xff]  ;;  %p563_p2 = por %p562_p1, %p561_p0 }
  0x53   :  { %413 = vmatprep.subr.bf16.mxu0 %v594_v0  ;;  %432 = vmatpush3.bf16.msra.mxu1 %v467_v22 }
  0x54   :  { %433 = vmatprep.subr.bf16.mxu1 %v594_v0  ;;  %p564_p3 = pnand %p563_p2, %p557_p13 }
  0x56   :  { %414 = vmatpush3.bf16.msra.mxu0 %v460_v13 }
  0x57   :  { %415 = vmatprep.subr.bf16.mxu0 %v594_v0  ;;  %434 = vmatpush3.bf16.msra.mxu1 %v468_v23 }
  0x58   :  { %435 = vmatprep.subr.bf16.mxu1 %v594_v0 }
  0x59   :  { %v100_v17 = vld [vmem:[#allocation2] sm:$0xff] }
  0x5a   :  { %416 = vmatpush3.bf16.msra.mxu0 %v461_v14  ;;  %v101_v18 = vpack.c.bf16 %v100_v17, %v100_v17 }
  0x5b   :  { %417 = vmatprep.subr.bf16.mxu0 %v594_v0  ;;  %436 = vmatpush3.bf16.msra.mxu1 %v469_v24 }
  0x5c   :  { %437 = vmatprep.subr.bf16.mxu1 %v594_v0 }
  0x5e   :  { %418 = vmatpush3.bf16.msra.mxu0 %v462_v15 }
  0x5f   :  { %419 = vmatprep.subr.bf16.mxu0 %v594_v0  ;;  %438 = vmatpush3.bf16.msra.mxu1 %v470_v25 }
  0x60   :  { %439 = vmatprep.subr.bf16.mxu1 %v594_v0 }
  0x62   :  { %420 = vmatpush3.bf16.msra.mxu0 %v463_v16 }
  0x63   :  { %440 = vmatpush3.bf16.msra.mxu1 %v471_v26 }
  0x65   :  { %422 = vmatmul.mubr.bf16.vlgmr.msra.gmra.mrb[0].mxu0 %v101_v18 }
 0x138   :  { %v207_v28 = vpop.f32.mrb[0].mxu0 }
 0x139   :  { %v208_v29 = vadd.f32 %v369_v27, %v207_v28  ;;  %v423_v30 = vpop.f32.mrb[1].mxu0 }
 0x13a   :  { %v210_v31 = vpop.f32.mrb[2].mxu0 }
 0x13b   :  { %v213_v32 = vsub.f32 0.0, %v208_v29  ;;  %v424_v33 = vpop.f32.mrb[3].mxu0 }
 0x13d   :  { %v214_v34 = vmul.f32 1.442695, %v213_v32 }
 0x13f   :  { %472 = vpow2.f32 %v214_v34 }
 0x149   :  { %v473_v35 = vpop.eup %472 }
 0x14a   :  { %v216_v36 = vadd.f32 1.0, %v473_v35 }
 0x14c   :  { %474 = vrcp.f32 %v216_v36 }
 0x156   :  { %v475_v37 = vpop.eup %474 }
 0x157   :  { %v218_v38 = vmul.f32 %v475_v37, %v208_v29 }
 0x159   :  { %v219_v39 = vpack.c.bf16 %v218_v38, %v218_v38 }
 0x15b   :  { %442 = vmatmul.mubr.bf16.vlgmr.msra.gmra.mrb[0].mxu1 %v219_v39 }
 0x22e   :  { %v325_v41 = vpop.f32.mrb[0].mxu1 }
 0x22f   :  { %v326_v42 = vadd.f32 %v378_v40, %v325_v41  ;;  %v443_v43 = vpop.f32.mrb[1].mxu1 }
 0x230   :  { %v328_v44 = vpop.f32.mrb[2].mxu1 }
 0x231   :  { %v331_v45 = vsub.f32 0.0, %v326_v42  ;;  %v444_v46 = vpop.f32.mrb[3].mxu1 }
 0x233   :  { %v332_v47 = vmul.f32 1.442695, %v331_v45 }
 0x235   :  { %476 = vpow2.f32 %v332_v47 }
 0x23f   :  { %v477_v48 = vpop.eup %476 }
 0x240   :  { %v334_v49 = vadd.f32 1.0, %v477_v48 }
 0x242   :  { %478 = vrcp.f32 %v334_v49 }
 0x24c   :  { %v479_v50 = vpop.eup %478 }
 0x24d   :  { %v336_v51 = vmul.f32 %v479_v50, %v326_v42 }
 0x24f   :  { %337 = vst [vmem:[#allocation11] sm:$0xff] %v336_v51 }
 0x250   :  { %567 = shalt.err (!%p564_p3)
}
 0x251   :  { %s568_s0 = scalar_lea.hbm %s734_s6, 128 }
 0x252   :  { %p569_p4 = scmp.ne.s32.totalorder %s734_s6, %s568_s0  ;;  %p572_p5 = scmp.lt.u32.totalorder %s568_s0, %s734_s6 }
 0x254   :  { %p574_p6 = pnand %p572_p5, %p569_p4 }
 0x256   :  { %577 = shalt.err (!%p574_p6)
}
 0x257   :  { %347 = dma.vmem_to_hbm [thread:$0]  %s345_s13, 128, %s734_s6, [#allocation7]  }
 0x258   :  { %584 = dma.done.wait [#allocation7], 128  }
 0x259   :  { %585 = vsyncadd [#allocation7], 4294967168 }
 0x25a   :  { %351 = vsyncpa [#allocation6], 1 }
 0x25b   :  { %352 = vsyncpa [#allocation9], 1 }
 0x25c   :  { %353 = vsyncpa [#allocation7], 1 }

</bundles_post_ra>
